<compile_context>
chip_gen: v7x
topology: tpu7x:2x2x1
jax: 0.10.0
libtpu: 0.0.40
codegen_flags: <defaults>
</compile_context>

<pallas_src>
import jax
import jax.numpy as jnp
from jax import lax
from jax.experimental import pallas as pl
from jax.experimental.pallas import tpu as pltpu


def _round_up(x, m):
    return ((x + m - 1) // m) * m


def _vmem_budgets():
    """Generation-aware (tile-sizing budget, compiler vmem limit) in bytes."""
    try:
        cap = int(pltpu.get_tpu_info().vmem_capacity_bytes)  # 128 MiB v5e/v6e, 64 MiB v7x
    except Exception:  # defensive fallback: assume v7x-sized VMEM
        cap = 64 * 1024 * 1024
    budget = max(min(int(cap * 0.40), 64 * 1024 * 1024), 8 * 1024 * 1024)
    limit = max(min(int(cap * 0.60), 96 * 1024 * 1024), budget + 4 * 1024 * 1024)
    return budget, limit


def _se_gate(pooled, w1f, w2f):
    """pooled: (C, 2) f32 = [avg | max]. Returns the sigmoid gate (C, 1) f32.

    Avg and max branches share one lane-width-2 matmul pair; this is O(C*C_r)
    and executes once per batch element, fully hidden under the tile DMA.
    """
    h = jnp.maximum(jnp.dot(w1f, pooled, preferred_element_type=jnp.float32), 0.0)
    out2 = jnp.dot(w2f, h, preferred_element_type=jnp.float32)        # (C, 2)
    return jax.nn.sigmoid(out2[:, 0:1] + out2[:, 1:2])                # (C, 1)


def _channel_attention_fused(x_flat, w1f, w2f, vmem_limit):
    """Single-pass kernel: grid (B,), one batch element's full (C, HW) per step."""
    B, C, HW = x_flat.shape
    C_r = w1f.shape[0]
    itemsize = jnp.dtype(x_flat.dtype).itemsize
    inv_hw = 1.0 / HW

    def kernel(x_ref, w1_ref, w2_ref, o_ref):
        x = x_ref[0]                                                   # (C, HW)
        s = jnp.sum(x, axis=-1, keepdims=True, dtype=jnp.float32)      # (C, 1)
        m = jnp.max(x, axis=-1, keepdims=True).astype(jnp.float32)     # (C, 1)
        col0 = lax.broadcasted_iota(jnp.int32, (C, 2), 1) == 0
        pooled = jnp.where(col0, s * inv_hw, m)                        # (C, 2) [avg|max]
        gate = _se_gate(pooled, w1_ref[...], w2_ref[...])              # (C, 1)
        o_ref[0] = x * gate.astype(o_ref.dtype)                        # lane-broadcast mul

    return pl.pallas_call(
        kernel,
        out_shape=jax.ShapeDtypeStruct((B, C, HW), x_flat.dtype),
        grid_spec=pltpu.PrefetchScalarGridSpec(
            num_scalar_prefetch=0,
            grid=(B,),
            in_specs=[
                pl.BlockSpec((1, C, HW), lambda b: (b, 0, 0)),
                pl.BlockSpec((C_r, C), lambda b: (0, 0)),
                pl.BlockSpec((C, C_r), lambda b: (0, 0)),
            ],
            out_specs=pl.BlockSpec((1, C, HW), lambda b: (b, 0, 0)),
        ),
        compiler_params=pltpu.CompilerParams(
            dimension_semantics=("parallel",),
            vmem_limit_bytes=vmem_limit),
        cost_estimate=pl.CostEstimate(
            flops=3 * B * C * HW + 8 * B * C * C_r,
            transcendentals=B * C,
            bytes_accessed=2 * B * C * HW * itemsize + 2 * C * C_r * 4),
    )(x_flat, w1f, w2f)


def _channel_attention_phased(x_flat, w1f, w2f, tile_hw, vmem_limit):
    """Single-call fallback: grid (B, 2, num_tiles); phase 0 pools, phase 1 gates."""
    B, C, HW = x_flat.shape
    C_r = w1f.shape[0]
    itemsize = jnp.dtype(x_flat.dtype).itemsize
    inv_hw = 1.0 / HW
    num_tiles = -(-HW // tile_hw)                 # cdiv -> masked tail tile if needed
    needs_mask = (num_tiles * tile_hw != HW)

    def kernel(x_ref, w1_ref, w2_ref, o_ref, acc_ref, gate_ref):
        p = pl.program_id(1)
        t = pl.program_id(2)
        col0 = lax.broadcasted_iota(jnp.int32, (C, 2), 1) == 0

        @pl.when((p == 0) & (t == 0))
        def _init():
            # column 0 = running sum, column 1 = running max (both f32)
            acc_ref[...] = jnp.where(col0, 0.0, -jnp.inf).astype(jnp.float32)

        @pl.when(p == 0)
        def _pool():
            x = x_ref[0]                                             # (C, TILE)
            if needs_mask:
                lane = lax.broadcasted_iota(jnp.int32, x.shape, 1) + t * tile_hw
                valid = lane < HW
                xs = jnp.where(valid, x, jnp.zeros_like(x))
                xm = jnp.where(valid, x, jnp.full_like(x, -jnp.inf))
            else:
                xs, xm = x, x
            s = jnp.sum(xs, axis=-1, keepdims=True, dtype=jnp.float32)
            m = jnp.max(xm, axis=-1, keepdims=True).astype(jnp.float32)
            acc = acc_ref[...]
            acc_ref[...] = jnp.where(col0, acc + s, jnp.maximum(acc, m))

        @pl.when((p == 0) & (t == num_tiles - 1))
        def _mlp():
            acc_fin = acc_ref[...]                                   # (C, 2)
            pooled = jnp.where(col0, acc_fin * inv_hw, acc_fin)      # [avg | max]
            gate_ref[...] = _se_gate(pooled, w1_ref[...], w2_ref[...])

        @pl.when(p == 1)
        def _apply():
            o_ref[0] = x_ref[0] * gate_ref[...].astype(o_ref.dtype)

    return pl.pallas_call(
        kernel,
        out_shape=jax.ShapeDtypeStruct((B, C, HW), x_flat.dtype),
        grid_spec=pltpu.PrefetchScalarGridSpec(
            num_scalar_prefetch=0,
            grid=(B, 2, num_tiles),
            in_specs=[
                pl.BlockSpec((1, C, tile_hw), lambda b, p, t: (b, 0, t)),
                pl.BlockSpec((C_r, C), lambda b, p, t: (0, 0)),
                pl.BlockSpec((C, C_r), lambda b, p, t: (0, 0)),
            ],
            # Phase 0 parks the output window on block (b, 0, 0): it is never
            # written there and never flushed (its index does not change until
            # phase 1 t=0 fully overwrites it).  Phase 1 walks and writes tiles.
            out_specs=pl.BlockSpec((1, C, tile_hw), lambda b, p, t: (b, 0, t * p)),
            scratch_shapes=[pltpu.VMEM((C, 2), jnp.float32),   # [sum | max] accumulator
                            pltpu.VMEM((C, 1), jnp.float32)],  # sigmoid gate (stays in VMEM)
        ),
        compiler_params=pltpu.CompilerParams(
            dimension_semantics=("parallel", "arbitrary", "arbitrary"),
            vmem_limit_bytes=vmem_limit),
        cost_estimate=pl.CostEstimate(
            flops=3 * B * C * HW + 8 * B * C * C_r,
            transcendentals=B * C,
            bytes_accessed=3 * B * C * HW * itemsize + 2 * C * C_r * 4),
    )(x_flat, w1f, w2f)


def channel_attention(x, w1, w2, *, tile_hw=None):
    """x: (B, C, H, W) NCHW; w1: (C_r, C); w2: (C, C_r).  Bias-free 1x1 convs.

    tile_hw: optional lane-tile override (forces the phased/tiled path when it
    is smaller than H*W); by default the path and tile are chosen from a
    generation-aware VMEM budget.
    """
    B, C, H, W = x.shape
    HW = H * W
    itemsize = jnp.dtype(x.dtype).itemsize

    budget, vmem_limit = _vmem_budgets()
    x_flat = x.reshape(B, C, HW)
    w1f = w1.astype(jnp.float32)     # hoist the f32 upcast out of the kernel
    w2f = w2.astype(jnp.float32)

    # TODO(synk): for v7x single-image inference (B == 1), split the HW
    # reduction across the 2 TensorCores (per-core partial (C,2) accumulators +
    # a tiny combine) so the pooling phase does not leave one core idle.

    hw_pad = _round_up(HW, 128)
    auto_fused = (4 * C * HW * itemsize <= budget) or (HW <= 128)
    if tile_hw is None:
        # Largest lane tile (multiple of 128) whose double-buffered in/out
        # blocks (plus mask temporaries for a ragged tail) fit the budget.
        bufs = 4 if HW % 128 == 0 else 6
        tile = max(128, (budget // (bufs * C * itemsize)) // 128 * 128)
    else:
        tile = _round_up(max(int(tile_hw), 1), 128)
    tile = min(tile, hw_pad)

    if (tile_hw is None and auto_fused) or tile >= HW:
        out_flat = _channel_attention_fused(x_flat, w1f, w2f, vmem_limit)
    else:
        out_flat = _channel_attention_phased(x_flat, w1f, w2f, tile, vmem_limit)
    return out_flat.reshape(B, C, H, W)


def channel_attention_ref(x, w1, w2):
    # Pure-JAX reference matching the PyTorch forward.
    xf = x.astype(jnp.float32)
    avg = jnp.mean(xf, axis=(2, 3))           # (B, C)
    mx = jnp.max(xf, axis=(2, 3))             # (B, C)

    def fc(v):                                # v: (B, C)
        h = jnp.maximum(v @ w1.T.astype(jnp.float32), 0.0)     # (B, C_r)
        return h @ w2.T.astype(jnp.float32)                     # (B, C)

    gate = jax.nn.sigmoid(fc(avg) + fc(mx))   # (B, C)
    return (xf * gate[:, :, None, None]).astype(x.dtype)


if __name__ == "__main__":
    # Small shapes consistent with the module: reduction_ratio=16 -> C=32, C_r=2
    B, C, H, W = 2, 32, 16, 16
    reduction_ratio = 16
    C_r = C // reduction_ratio

    key = jax.random.PRNGKey(0)
    kx, k1, k2, kx2 = jax.random.split(key, 4)

    x = jax.random.normal(kx, (B, C, H, W), dtype=jnp.float32)
    # Deterministic synthetic weights for the two bias-free 1x1 convs.
    w1 = jax.random.normal(k1, (C_r, C), dtype=jnp.float32) * (1.0 / C ** 0.5)
    w2 = jax.random.normal(k2, (C, C_r), dtype=jnp.float32) * (1.0 / max(C_r, 1) ** 0.5)

    ref = channel_attention_ref(x, w1, w2)

    # 1) Fully fused single-pass path (one batch element's map fits VMEM).
    out_fused = jax.block_until_ready(channel_attention(x, w1, w2))
    assert out_fused.shape == (B, C, H, W)
    assert jnp.allclose(out_fused, ref, atol=1e-5, rtol=1e-5)

    # 2) Single-call phased path (forced 128-lane tile -> 2 HW tiles, gate kept in VMEM).
    out_tiled = jax.block_until_ready(channel_attention(x, w1, w2, tile_hw=128))
    assert jnp.allclose(out_tiled, ref, atol=1e-5, rtol=1e-5)

    # 3) Phased path with a non-128-multiple spatial size (masked tail tile).
    x_odd = jax.random.normal(kx2, (B, C, 15, 15), dtype=jnp.float32)
    out_odd = jax.block_until_ready(channel_attention(x_odd, w1, w2, tile_hw=128))
    ref_odd = channel_attention_ref(x_odd, w1, w2)
    assert jnp.allclose(out_odd, ref_odd, atol=1e-5, rtol=1e-5)

    print("KERNEL_OK")
</pallas_src>

<mosaic_0001>
module attributes {stable_mosaic.version = 11 : i64} {
  func.func @kernel(%arg0: i32, %arg1: memref<1x32x256xf32, #tpu.memory_space<vmem>>, %arg2: memref<2x32xf32, #tpu.memory_space<vmem>>, %arg3: memref<32x2xf32, #tpu.memory_space<vmem>>, %arg4: memref<1x32x256xf32, #tpu.memory_space<vmem>>) attributes {dimension_semantics = [#tpu.dimension_semantics<parallel>], iteration_bounds = array<i64: 2>, scalar_prefetch = 0 : i64, scratch_operands = 0 : i64, tpu.core_type = #tpu.core_type<tc>, window_params = [{transform_indices = @transform_0, window_bounds = array<i64: 1, 32, 256>}, {pipeline_mode = #tpu.pipeline_mode<synchronous>, transform_indices = @transform_1, window_bounds = array<i64: 2, 32>}, {pipeline_mode = #tpu.pipeline_mode<synchronous>, transform_indices = @transform_2, window_bounds = array<i64: 32, 2>}, {transform_indices = @transform_3, window_bounds = array<i64: 1, 32, 256>}]} {
    %c0 = arith.constant 0 : index
    %c0_0 = arith.constant 0 : index
    %c0_1 = arith.constant 0 : index
    %0 = vector.load %arg1[%c0, %c0_0, %c0_1] : memref<1x32x256xf32, #tpu.memory_space<vmem>>, vector<1x32x256xf32>
    %1 = vector.shape_cast %0 : vector<1x32x256xf32> to vector<32x256xf32>
    %cst = arith.constant dense<0.000000e+00> : vector<32xf32>
    %2 = vector.multi_reduction <add>, %1, %cst [1] : vector<32x256xf32> to vector<32xf32>
    %3 = vector.shape_cast %2 : vector<32xf32> to vector<32x1xf32>
    %cst_2 = arith.constant dense<0xFF800000> : vector<32xf32>
    %4 = vector.multi_reduction <maximumf>, %1, %cst_2 [1] : vector<32x256xf32> to vector<32xf32>
    %5 = vector.shape_cast %4 : vector<32xf32> to vector<32x1xf32>
    %6 = tpu.iota {dimensions = array<i32: 1>} : vector<32x2xi32>
    %c0_i32 = arith.constant 0 : i32
    %7 = vector.broadcast %c0_i32 : i32 to vector<32x2xi32>
    %8 = arith.cmpi eq, %6, %7 : vector<32x2xi32>
    %cst_3 = arith.constant 3.906250e-03 : f32
    %9 = vector.broadcast %cst_3 : f32 to vector<32x1xf32>
    %10 = arith.mulf %3, %9 : vector<32x1xf32>
    %11 = vector.shape_cast %10 : vector<32x1xf32> to vector<32x1xf32>
    %12 = vector.broadcast %11 : vector<32x1xf32> to vector<32x2xf32>
    %13 = vector.shape_cast %5 : vector<32x1xf32> to vector<32x1xf32>
    %14 = vector.broadcast %13 : vector<32x1xf32> to vector<32x2xf32>
    %15 = arith.select %8, %12, %14 : vector<32x2xi1>, vector<32x2xf32>
    %c0_4 = arith.constant 0 : index
    %c0_5 = arith.constant 0 : index
    %16 = vector.load %arg2[%c0_4, %c0_5] : memref<2x32xf32, #tpu.memory_space<vmem>>, vector<2x32xf32>
    %c0_6 = arith.constant 0 : index
    %c0_7 = arith.constant 0 : index
    %17 = vector.load %arg3[%c0_6, %c0_7] : memref<32x2xf32, #tpu.memory_space<vmem>>, vector<32x2xf32>
    %cst_8 = arith.constant dense<0.000000e+00> : vector<2x2xf32>
    %18 = tpu.matmul %16, %15, %cst_8 {dimension_numbers = #tpu.dot_dimension_numbers<[1], [0], [0], [1], [0, 0, 1, 1], [], []>} : vector<2x32xf32>, vector<32x2xf32>, vector<2x2xf32> -> vector<2x2xf32>
    %cst_9 = arith.constant 0.000000e+00 : f32
    %19 = vector.broadcast %cst_9 : f32 to vector<2x2xf32>
    %20 = arith.maximumf %18, %19 : vector<2x2xf32>
    %cst_10 = arith.constant dense<0.000000e+00> : vector<32x2xf32>
    %21 = tpu.matmul %17, %20, %cst_10 {dimension_numbers = #tpu.dot_dimension_numbers<[1], [0], [0], [1], [0, 0, 1, 1], [], []>} : vector<32x2xf32>, vector<2x2xf32>, vector<32x2xf32> -> vector<32x2xf32>
    %22 = vector.extract_strided_slice %21 {offsets = [0, 0], sizes = [32, 1], strides = [1, 1]} : vector<32x2xf32> to vector<32x1xf32>
    %23 = vector.extract_strided_slice %21 {offsets = [0, 1], sizes = [32, 1], strides = [1, 1]} : vector<32x2xf32> to vector<32x1xf32>
    %24 = arith.addf %22, %23 : vector<32x1xf32>
    %25 = arith.negf %24 : vector<32x1xf32>
    %26 = math.exp %25 : vector<32x1xf32>
    %cst_11 = arith.constant 1.000000e+00 : f32
    %27 = vector.broadcast %cst_11 : f32 to vector<32x1xf32>
    %28 = arith.addf %27, %26 : vector<32x1xf32>
    %29 = arith.divf %27, %28 : vector<32x1xf32>
    %30 = vector.broadcast %29 : vector<32x1xf32> to vector<32x256xf32>
    %31 = arith.mulf %1, %30 : vector<32x256xf32>
    %c0_12 = arith.constant 0 : index
    %c0_13 = arith.constant 0 : index
    %c0_14 = arith.constant 0 : index
    %32 = vector.load %arg4[%c0_12, %c0_13, %c0_14] : memref<1x32x256xf32, #tpu.memory_space<vmem>>, vector<1x32x256xf32>
    %33 = vector.shape_cast %32 : vector<1x32x256xf32> to vector<32x256xf32>
    %34 = vector.shape_cast %31 : vector<32x256xf32> to vector<1x32x256xf32>
    tpu.vector_store %arg4[%c0_12, %c0_13, %c0_14], %34 {strides = array<i32>} : memref<1x32x256xf32, #tpu.memory_space<vmem>>, vector<1x32x256xf32>,
    return
  }
  func.func @transform_0(%arg0: i32) -> (i32, i32, i32) {
    %c0_i32 = arith.constant 0 : i32
    %c0_i32_0 = arith.constant 0 : i32
    %c0_i32_1 = arith.constant 0 : i32
    return %arg0, %c0_i32, %c0_i32_0 : i32, i32, i32
  }
  func.func @transform_1(%arg0: i32) -> (i32, i32) {
    %c0_i32 = arith.constant 0 : i32
    %c0_i32_0 = arith.constant 0 : i32
    %c0_i32_1 = arith.constant 0 : i32
    return %c0_i32, %c0_i32_0 : i32, i32
  }
  func.func @transform_2(%arg0: i32) -> (i32, i32) {
    %c0_i32 = arith.constant 0 : i32
    %c0_i32_0 = arith.constant 0 : i32
    %c0_i32_1 = arith.constant 0 : i32
    return %c0_i32, %c0_i32_0 : i32, i32
  }
  func.func @transform_3(%arg0: i32) -> (i32, i32, i32) {
    %c0_i32 = arith.constant 0 : i32
    %c0_i32_0 = arith.constant 0 : i32
    %c0_i32_1 = arith.constant 0 : i32
    return %arg0, %c0_i32, %c0_i32_0 : i32, i32, i32
  }
}

</mosaic_0001>

<bundles_post_ra>
// kernel: tpu_custom_call.1
= control target key start
LH: loop header
LB: loop body
LE: loop exit
PB: predicated region body
PF: predicated region fallthrough
CT: control target
= control target key end

     0   :  { %8 = vsyncpa [#allocation3], 0  ;;  %s1065_s0 = inlined_call_operand.hbm [shape: f32[2,32,256], index: 0, kind: input, shape index: {}]   ;;  %s1066_s1 = inlined_call_operand.vmem [shape: f32[2,32], index: 1, kind: input, shape index: {}]   ;;  %s1067_s2 = inlined_call_operand.vmem [shape: f32[32,2], index: 2, kind: input, shape index: {}]   ;;  %s1068_s3 = inlined_call_operand.hbm [shape: f32[2,32,256], index: 3, kind: output, shape index: {}]  }
   0x1   :  { %10 = vsyncpa [#allocation3 + $0x1], 0 }
   0x2   :  { %11 = vsyncpa [#allocation4], 0 }
   0x3   :  { %13 = vsyncpa [#allocation4 + $0x1], 0  ;;  %s844_s12 = smov 0   ;;  %s846_s13 = smov 0  }
   0x4   :  { %s848_s14 = smov 0   ;;  %s850_s15 = smov 0  }
   0x5 LB: > { %s865_s16 = sadd.s32 4294967295, %s811_s15   ;;  %s581_s17 = sadd.s32 4294967294, %s811_s15   ;;  %s811_s15 = sphi %s850_s15, %s1081_s15   ;;  %s807_s14 = sphi %s848_s14, %s1080_s14   ;;  %s803_s13 = sphi %s846_s13, %s1079_s13   ;;  %s799_s12 = sphi %s844_s12, %s1078_s12  }
   0x6   : > { %s869_s18 = sadd.s32 1, %s811_s15   ;;  %s26_s19 = sadd.s32 1, %s807_s14 }
   0x7   : > { %s23_s20 = ssub.s32 %s811_s15, %s869_s18  ;;  %p33_p0 = scmp.ne.s32.totalorder %s807_s14, %s803_s13 }
   0x8   : > { %p24_p1 = scmp.eq.s32.totalorder %s23_s20, 0  ;;  %p34_p2 = scmp.eq.s32.totalorder %s811_s15, 0 }
   0x9   : > { %p39_p3 = scmp.ne.s32.totalorder %s803_s13, %s799_s12  ;;  %p40_p4 = scmp.eq.s32.totalorder %s865_s16, 0 }
   0xa   : > { %s881_s21 = scalar_select %p24_p1, %s807_s14, %s26_s19  }
   0xb   : > { %p883_p5 = por %p34_p2, %p33_p0  ;;  %p887_p6 = por %p40_p4, %p39_p3 }
   0xc   : > { %p105_p7 = scmp.eq.s32.totalorder %s865_s16, 1  ;;  %p111_p8 = scmp.eq.s32.totalorder %s581_s17, 1 }
   0xd   : > { %p654_p10 = scmp.lt.s32.totalorder %s811_s15, 2  ;;  %s137_s26 = sand.u32 1, %s807_s14  }
   0xe   : > { %p894_p11 = por %p105_p7, %p33_p0  ;;  %p898_p12 = por %p111_p8, %p39_p3 }
   0xf   : > { %s605_s27 = sshll.u32 %s811_s15, 10  ;;  %s584_s28 = sshll.u32 %s137_s26, 6 }
  0x10   : > { %s1072_s24 = scalar_select %p894_p11, 1, 0 }
  0x11   : > { %s1073_s25 = scalar_select %p898_p12, 1, 0 }
  0x12   : > { %s907_s4 = scalar_lea.hbm %s1065_s0, %s605_s27  ;;  %s141_s5 = scalar_lea.vmem [#allocation2], %s584_s28 }
  0x13   : > { %s148_s6 = sshll.u32 %s141_s5, 4  ;;  %p911_p13 = pnand %p654_p10, %p883_p5  ;;  %s915_s6 = int_to_ptr.vmem [resolvable:$true] %s148_s6 }
  0x14   : > { %s917_s8 = scalar_lea.sflag [#allocation3], %s137_s26  ;;  %s715_s9 = scalar_lea.hbm %s907_s4, 1024 }
  0x15   : > { %p716_p0 = scmp.ne.s32.totalorder %s907_s4, %s715_s9  ;;  %p717_p1 = pneg %p911_p13 }
  0x16   : > { %s720_s17 = scalar_lea.hbm %s1065_s0, 2048  ;;  %p721_p4 = scmp.lt.u32.totalorder %s907_s4, %s1065_s0 }
  0x17   : > { %p718_p2 = pnand %p717_p1, %p716_p0  ;;  %p722_p5 = scmp.lt.u32.totalorder %s720_s17, %s715_s9 }
  0x18   : > { %p724_p8 = scmp.lt.u32.totalorder %s715_s9, %s907_s4 }
  0x19   : > { %p719_p3 = pneg %p718_p2  ;;  %p723_p7 = por %p722_p5, %p721_p4 }
  0x1b   : > { %p725_p10 = por %p724_p8, %p723_p7 }
  0x1d   : > { %p726_p9 = pnand %p725_p10, %p719_p3 }
  0x1f   : > { %729 = shalt.err (!%p726_p9)
}
  0x20   : > { %s730_s22 = scalar_lea.vmem %s915_s6, 1024  ;;  %s813_s26 = smov [#allocation2]  }
  0x21   : > { %p731_p0 = scmp.ne.s32.totalorder %s915_s6, %s730_s22  ;;  %s735_s27 = sshll.u32 %s813_s26, 4  ;;  %s736_s27 = int_to_ptr.vmem [resolvable:$false] %s735_s27 }
  0x22   : > { %s737_s28 = scalar_lea.vmem %s736_s27, 2048  ;;  %p738_p11 = scmp.lt.s32.totalorder %s915_s6, %s736_s27 }
  0x23   : > { %p733_p2 = pnand %p731_p0, %p717_p1  ;;  %p739_p4 = scmp.lt.s32.totalorder %s737_s28, %s730_s22 }
  0x25   : > { %p734_p12 = pneg %p733_p2  ;;  %p740_p5 = por %p739_p4, %p738_p11 }
  0x27   : > { %p741_p7 = pnand %p740_p5, %p734_p12 }
  0x29   : > { %744 = shalt.err (!%p741_p7)
}
  0x2a   : > { %s814_s29 = smov 256   ;;  %s815_s30 = smov 16  }
  0x2b   : > { %649 = dma.hbm_to_vmem [thread:$0]  (!%p911_p13), %s907_s4, 1024, %s915_s6, %s917_s8, %s814_s29, %s814_s29, %s815_s30  }
  0x2c   : > { %p587_p9 = scmp.ge.s32.totalorder %s811_s15, 1  ;;  %p156_p1 = scmp.lt.s32.totalorder %s811_s15, 3 }
  0x2e   : > { %p157_p3 = pnand %p587_p9, %p156_p1 }
  0x2f   : > { %s948_s5 = sand.u32 (!%p157_p3), 1, %s803_s13  }
  0x30   : > { %160 = sbr.rel (%p157_p3) target bundleno = 944 (0x3b0), region = 32  ;;  %s588_s9 = sshll.u32 (!%p157_p3), %s948_s5, 6 }
  0x31   : > { %s163_s10 = scalar_lea.sflag (!%p157_p3), [#allocation3], %s948_s5  ;;  %s166_s11 = scalar_lea.vmem (!%p157_p3), [#allocation2], %s588_s9 }
  0x37   : > { %790 = dma.done.wait (%p887_p6), %s163_s10, 1024  }
  0x38   : > { %792 = vsyncadd (%p887_p6), %s163_s10, 4294966272  ;;  %v958_v0 = vld [vmem:[%s166_s11] sm:$0xff]  ;;  %v960_v1 = vld [vmem:[%s166_s11 + $0x8] sm:$0xff]  ;;  %v816_v16 = vmov 0.0|0.0   ;;  %vm817_vm0 = vmmov 0   ;;  %v818_v17 = vmov 0.0   ;;  %v221_v18 = vlaneseq }
  0x39   : > { %v962_v2 = vld [vmem:[%s166_s11 + $0x10] sm:$0xff]  ;;  %v209_v3 = vmax.f32 %v958_v0, %v960_v1  ;;  %v197_v4 = vadd.f32 %v960_v1, %v958_v0  ;;  %v968_v5 = vld [vmem:[%s166_s11 + $0x18] sm:$0xff]  ;;  %v978_v10 = vld [vmem:[%s166_s11 + $0x20] sm:$0xff]  ;;  %636 = vmatprep.subr.bf16.mxu0 %v816_v16  ;;  %625 = vmatprep.mubr.msk.f32.mxu0 %vm817_vm0, %v818_v17  ;;  %vm237_vm2 = vcmask 261120   ;;  %vm312_vm3 = vcmask 15360   ;;  %s819_s27 = smov 127  }
  0x3a   : > { %v212_v6 = vmax.f32 %v962_v2, %v968_v5  ;;  %v200_v7 = vadd.f32 %v968_v5, %v962_v2  ;;  %v974_v8 = vld [vmem:[%s166_s11 + $0x30] sm:$0xff]  ;;  %v976_v9 = vld [vmem:[%s166_s11 + $0x38] sm:$0xff]  ;;  %v980_v11 = vld [vmem:[%s166_s11 + $0x28] sm:$0xff]  ;;  %v222_v21 = vand.u32 127, %v221_v18  ;;  %vm325_vm4 = vcmask 1041408   ;;  %s188_s28 = scalar_lea.vmem [#allocation5], %s588_s9 }
  0x3b   : > { %210 = vmax.xlane.f32.xlu1 %v209_v3  ;;  %198 = vadd.xlane.f32.xlu0 %v197_v4  ;;  %v206_v12 = vadd.f32 %v976_v9, %v974_v8  ;;  %v203_v13 = vadd.f32 %v980_v11, %v978_v10  ;;  %v218_v14 = vmax.f32 %v974_v8, %v976_v9  ;;  %v232_v38 = vld [vmem:[%s1066_s1] sm:$0x3]  ;;  %v234_v43 = vld [vmem:[%s1067_s2 + $0x8] sm:$0xff]  ;;  %v235_v44 = vld [vmem:[%s1067_s2 + $0x10] sm:$0xff]  ;;  %v820_v50 = vmov 0   ;;  %s508_s29 = sshll.u32 %s188_s28, 4  ;;  %s1014_s29 = int_to_ptr.vmem [resolvable:$true] %s508_s29 }
  0x3c   : > { %v215_v15 = vmax.f32 %v978_v10, %v980_v11  ;;  %vm223_vm1 = vcmp.eq.s32.totalorder %v222_v21, 0  ;;  %v233_v39 = vld [vmem:[%s1067_s2] sm:$0xff]  ;;  %v236_v45 = vld [vmem:[%s1067_s2 + $0x18] sm:$0xff]  ;;  %697 = vset.pattern.permute.xlu1 %v820_v50  ;;  %698 = vset.pattern.permute.xlu0 %v820_v50  ;;  %s606_s30 = sshll.u32 %s865_s16, 10  ;;  %s495_s16 = scalar_lea.sflag [#allocation4], %s948_s5 }
  0x3d   : > { %630 = vmatprep.mubr.msk.f32.mxu1 %vm312_vm3, %v233_v39  ;;  %s1019_s11 = scalar_lea.hbm %s1068_s3, %s606_s30  ;;  %s745_s23 = scalar_lea.vmem %s1014_s29, 1024 }
  0x3e   : > { %p746_p6 = scmp.ne.s32.totalorder %s1014_s29, %s745_s23  ;;  %p1075_p11 = scmp.ne.s32.totalorder %s1072_s24, 0 }
  0x3f   : > { %213 = vmax.xlane.f32.xlu1 %v212_v6  ;;  %201 = vadd.xlane.f32.xlu0 %v200_v7  ;;  %s821_s4 = smov [#allocation5]  }
  0x40   : > { %p747_p12 = pnand %p746_p6, %p1075_p11  ;;  %s749_s6 = sshll.u32 %s821_s4, 4  ;;  %s750_s6 = int_to_ptr.vmem [resolvable:$false] %s749_s6 }
  0x41   : > { %s751_s7 = scalar_lea.vmem %s750_s6, 2048  ;;  %p752_p8 = scmp.lt.s32.totalorder %s1014_s29, %s750_s6 }
  0x42   : > { %p748_p13 = pneg %p747_p12  ;;  %p753_p10 = scmp.lt.s32.totalorder %s751_s7, %s745_s23 }
  0x43   : > { %207 = vadd.xlane.f32.xlu1 %v206_v12  ;;  %204 = vadd.xlane.f32.xlu0 %v203_v13 }
  0x44   : > { %p754_p0 = por %p753_p10, %p752_p8 }
  0x46   : > { %p755_p2 = pnand %p754_p0, %p748_p13 }
  0x47   : > { %219 = vmax.xlane.f32.xlu1 %v218_v14  ;;  %216 = vmax.xlane.f32.xlu0 %v215_v15 }
  0xc8   : > { %v211_v19 = vpop.xlane.xlu1 %210  ;;  %v199_v20 = vpop.xlane.xlu0 %198 }
  0xc9   : > { %v224_v22 = vmul.f32 0.00390625, %v199_v20 }
  0xcb   : > { %v228_v26 = vsel %vm223_vm1, %v224_v22, %v211_v19 }
  0xcc   : > { %v214_v23 = vpop.xlane.xlu1 %213  ;;  %v202_v24 = vpop.xlane.xlu0 %201 }
  0xcd   : > { %v225_v25 = vmul.f32 0.00390625, %v202_v24 }
  0xcf   : > { %v229_v27 = vsel %vm223_vm1, %v225_v25, %v214_v23 }
  0xd0   : > { %v208_v28 = vpop.xlane.xlu1 %207  ;;  %v205_v29 = vpop.xlane.xlu0 %204  ;;  %v637_v30 = vpack.c.bf16 %v229_v27, %v228_v26 }
  0xd1   : > { %v227_v31 = vmul.f32 0.00390625, %v208_v28  ;;  %v226_v32 = vmul.f32 0.00390625, %v205_v29 }
  0xd2   : > { %638 = vmatpush3.bf16.msra.mxu0 %v637_v30 }
  0xd3   : > { %639 = vmatprep.subr.bf16.mxu0 %v816_v16 }
  0xd4   : > { %v220_v33 = vpop.xlane.xlu1 %219  ;;  %v217_v34 = vpop.xlane.xlu0 %216 }
  0xd5   : > { %v231_v35 = vsel %vm223_vm1, %v227_v31, %v220_v33  ;;  %v230_v36 = vsel %vm223_vm1, %v226_v32, %v217_v34 }
  0xd6   : > { %v640_v37 = vpack.c.bf16 %v231_v35, %v230_v36 }
  0xd8   : > { %641 = vmatpush3.bf16.msra.mxu0 %v640_v37 }
  0xdb   : > { %626 = vmatmul.mubr.msk.f32.vlgmr.msra.gmra.mrb[0].mxu0 %vm237_vm2, %v232_v38 }
 0x1ae   : > { %v307_v40 = vpop.f32.mrb[0].mxu0 }
 0x1af   : > { %v311_v41 = vmax.f32 %v307_v40, 0.0  ;;  %v627_v42 = vpop.f32.mrb[1].mxu0 }
 0x1b1   : > { %628 = vmatprep.subr.msk.mxu1 %vm325_vm4, %v311_v41 }
 0x1b2   : > { %629 = vmatpush3.msk.msra.mxu1 %vm325_vm4, %v311_v41 }
 0x1b3   : > { %631 = vmatmul.mubr.msk.f32.vlgmr.msra.gmra.mrb[0].mxu1 %vm312_vm3, %v234_v43 }
 0x1b4   : > { %633 = vmatprep.mubr.msk.f32.mxu1 %vm312_vm3, %v235_v44 }
 0x1b7   : > { %634 = vmatmul.mubr.msk.f32.gmra.mrb[2].mxu1 %vm312_vm3, %v236_v45 }
 0x286   : > { %v632_v46 = vpop.f32.mrb[0].mxu1 }
 0x287   : > { %420 = vrot.lane.b32.xlu1 %v632_v46, %s819_s27  ;;  %v395_v47 = vpop.f32.mrb[1].mxu1 }
 0x288   : > { %418 = vrot.lane.b32.xlu0 %v395_v47, %s819_s27 }
 0x28a   : > { %v635_v48 = vpop.f32.mrb[2].mxu1 }
 0x28b   : > { %v405_v49 = vpop.f32.mrb[3].mxu1 }
 0x28c   : > { %422 = vrot.lane.b32.xlu1 %v405_v49, %s819_s27 }
 0x290   : > { %424 = vrot.lane.b32.xlu1 %v635_v48, %s819_s27 }
 0x2f9   : > { %v421_v51 = vpop.permute.xlu1 %420 }
 0x2fa   : > { %v431_v52 = vadd.f32 %v632_v46, %v421_v51  ;;  %v419_v53 = vpop.permute.xlu0 %418 }
 0x2fb   : > { %v430_v54 = vadd.f32 %v419_v53, %v395_v47 }
 0x2fc   : > { %v597_v55 = vmul.f32 -1.442695, %v431_v52 }
 0x2fd   : > { %v596_v56 = vmul.f32 -1.442695, %v430_v54 }
 0x2fe   : > { %699 = vpow2.f32 %v597_v55  ;;  %v423_v57 = vpop.permute.xlu1 %422 }
 0x2ff   : > { %701 = vpow2.f32 %v596_v56  ;;  %v432_v58 = vadd.f32 %v423_v57, %v405_v49 }
 0x301   : > { %v598_v59 = vmul.f32 -1.442695, %v432_v58 }
 0x302   : > { %v425_v60 = vpop.permute.xlu1 %424 }
 0x303   : > { %703 = vpow2.f32 %v598_v59  ;;  %v433_v61 = vadd.f32 %v635_v48, %v425_v60 }
 0x305   : > { %v599_v62 = vmul.f32 -1.442695, %v433_v61 }
 0x307   : > { %705 = vpow2.f32 %v599_v62 }
 0x308   : > { %v700_v63 = vpop.eup %699 }
 0x309   : > { %v702_v3 = vpop.eup %701  ;;  %v447_v4 = vadd.f32 1.0, %v700_v63 }
 0x30a   : > { %v446_v6 = vadd.f32 1.0, %v702_v3 }
 0x30b   : > { %707 = vrcp.f32 %v447_v4 }
 0x30c   : > { %709 = vrcp.f32 %v446_v6 }
 0x30d   : > { %v704_v7 = vpop.eup %703 }
 0x30e   : > { %v448_v12 = vadd.f32 1.0, %v704_v7 }
 0x310   : > { %711 = vrcp.f32 %v448_v12 }
 0x311   : > { %v706_v13 = vpop.eup %705 }
 0x312   : > { %v449_v14 = vadd.f32 1.0, %v706_v13 }
 0x314   : > { %713 = vrcp.f32 %v449_v14 }
 0x315   : > { %v708_v15 = vpop.eup %707 }
 0x316   : > { %v710_v16 = vpop.eup %709  ;;  %465 = vperm.xlu1 %697, %v708_v15  }
 0x317   : > { %460 = vperm.xlu0 %698, %v710_v16  }
 0x31a   : > { %v712_v17 = vpop.eup %711 }
 0x31b   : > { %470 = vperm.xlu1 %697, %v712_v17  }
 0x31e   : > { %v714_v18 = vpop.eup %713 }
 0x31f   : > { %475 = vperm.xlu0 %698, %v714_v18  }
 0x395   : > { %v466_v19 = vpop.permute.xlu1 %465 }
 0x396   : > { %v480_v20 = vmul.f32 %v466_v19, %v962_v2  ;;  %v481_v21 = vmul.f32 %v466_v19, %v968_v5  ;;  %v461_v22 = vpop.permute.xlu0 %460 }
 0x397   : > { %v478_v23 = vmul.f32 %v461_v22, %v958_v0  ;;  %v479_v24 = vmul.f32 %v461_v22, %v960_v1 }
 0x398   : > { %488 = vst [vmem:[%s188_s28 + $0x10] sm:$0xff] %v480_v20  ;;  %489 = vst [vmem:[%s188_s28 + $0x18] sm:$0xff] %v481_v21 }
 0x399   : > { %486 = vst [vmem:[%s188_s28] sm:$0xff] %v478_v23  ;;  %487 = vst [vmem:[%s188_s28 + $0x8] sm:$0xff] %v479_v24 }
 0x39a   : > { %v471_v25 = vpop.permute.xlu1 %470 }
 0x39b   : > { %v482_v26 = vmul.f32 %v471_v25, %v978_v10  ;;  %v483_v2 = vmul.f32 %v471_v25, %v980_v11 }
 0x39d   : > { %490 = vst [vmem:[%s188_s28 + $0x20] sm:$0xff] %v482_v26  ;;  %491 = vst [vmem:[%s188_s28 + $0x28] sm:$0xff] %v483_v2 }
 0x39e   : > { %v476_v0 = vpop.permute.xlu0 %475 }
 0x39f   : > { %v484_v1 = vmul.f32 %v476_v0, %v974_v8  ;;  %v485_v5 = vmul.f32 %v476_v0, %v976_v9 }
 0x3a1   : > { %492 = vst [vmem:[%s188_s28 + $0x30] sm:$0xff] %v484_v1  ;;  %493 = vst [vmem:[%s188_s28 + $0x38] sm:$0xff] %v485_v5 }
 0x3a2   : > { %758 = shalt.err (!%p755_p2)
}
 0x3a3   : > { %s759_s8 = scalar_lea.hbm %s1019_s11, 1024  ;;  %s763_s20 = scalar_lea.hbm %s1068_s3, 2048 }
 0x3a4   : > { %p760_p4 = scmp.ne.s32.totalorder %s1019_s11, %s759_s8  ;;  %p764_p9 = scmp.lt.u32.totalorder %s1019_s11, %s1068_s3 }
 0x3a5   : > { %p765_p1 = scmp.lt.u32.totalorder %s763_s20, %s759_s8  ;;  %p767_p6 = scmp.lt.u32.totalorder %s759_s8, %s1019_s11 }
 0x3a6   : > { %p761_p5 = pnand %p760_p4, %p1075_p11 }
 0x3a7   : > { %p766_p3 = por %p765_p1, %p764_p9 }
 0x3a8   : > { %p762_p7 = pneg %p761_p5 }
 0x3a9   : > { %p768_p12 = por %p767_p6, %p766_p3 }
 0x3ab   : > { %p769_p13 = pnand %p768_p12, %p762_p7 }
 0x3ad   : > { %772 = shalt.err (!%p769_p13)
}
 0x3ae   : > { %s822_s27 = smov 256   ;;  %s823_s28 = smov 16  }
 0x3af   : > { %644 = dma.vmem_to_hbm [thread:$0]  (%p1075_p11), %s1014_s29, 1024, %s1019_s11, %s495_s16, %s822_s27, %s822_s27, %s823_s28  }
 0x3b0 PF: > { %s523_s30 = sand.u32 1, %s799_s12   ;;  %p1076_p8 = scmp.ne.s32.totalorder %s1073_s25, 0 }
 0x3b1   : > { %p1077_p10 = scmp.ge.s32.totalorder %s811_s15, 2  ;;  %s524_s9 = scalar_lea.sflag [#allocation4], %s523_s30 }
 0x3b3   : > { %p651_p0 = pnand %p1077_p10, %p1076_p8 }
 0x3b5   : > { %794 = dma.done.wait (!%p651_p0), %s524_s9, 1024  }
 0x3b6   : > { %796 = vsyncadd (!%p651_p0), %s524_s9, 4294966272  ;;  %p16_p2 = scmp.ge.s32.totalorder %s869_s18, 4   ;;  %s1078_s12 = smov %s803_s13 }
 0x3b7   : > { %s1079_s13 = smov %s807_s14  ;;  %s1080_s14 = smov %s881_s21 }
 0x3b8   : > { %s1081_s15 = smov %s869_s18  ;;  %18 = sbr.rel (!%p16_p2) target bundleno = 5 (0x5), region = 77 }
 0x3bf   :  { %529 = vsyncpa [#allocation3], 1 }
 0x3c0   :  { %531 = vsyncpa [#allocation3 + $0x1], 1 }
 0x3c1   :  { %532 = vsyncpa [#allocation4], 1 }
 0x3c2   :  { %534 = vsyncpa [#allocation4 + $0x1], 1 }

</bundles_post_ra>
